<compile_context>
chip_gen: v7x
topology: tpu7x:2x2x1
jax: 0.10.0
libtpu: 0.0.40
codegen_flags: <defaults>
</compile_context>

<pallas_src>
import functools

import jax
import jax.numpy as jnp
from jax.experimental import pallas as pl
from jax.experimental.pallas import tpu as pltpu


NEG_SLOPE = 0.01  # PyTorch LeakyReLU default


def _round_up(n, m):
    return ((n + m - 1) // m) * m


def _has_bf16_vpu():
    """bf16 VALU exists on v6e/v7x; v5e and older should use the f32 path."""
    try:
        kind = jax.devices()[0].device_kind.lower()
    except Exception:
        return False
    return not any(old in kind for old in ("v2", "v3", "v4", "v5"))


def brain_mlp_kernel(x_ref,
                     w1_ref, b1_ref,
                     w2_ref, b2_ref,
                     w3_ref, b3_ref,
                     w4_ref, b4_ref,
                     o_ref, *, bf16_act):
    """Fused 4-layer MLP. All weights VMEM-resident, one batch tile per step.

    Matmuls run in bf16 on the MXU with f32 accumulation.  Bias-add +
    LeakyReLU run in bf16 when bf16_act (v6e/v7x) else in f32 (v5e).
    Dropout is eval-mode identity.
    """

    def layer(h_bf16, w_ref, b_ref):
        acc = jnp.dot(h_bf16, w_ref[...], preferred_element_type=jnp.float32)
        if bf16_act:
            a = acc.astype(jnp.bfloat16) + b_ref[...]        # bf16 VPU
            return jnp.maximum(a, a * NEG_SLOPE)             # stays bf16 for next MXU op
        a = acc + b_ref[...]                                 # f32 VPU (v5e)
        a = jnp.maximum(a, a * NEG_SLOPE)
        return a.astype(jnp.bfloat16)

    h = x_ref[...].astype(jnp.bfloat16)                      # in-kernel cast: f32 HBM in, bf16 MXU operand
    h = layer(h, w1_ref, b1_ref)                             # (TB, s) @ (s, 256)
    h = layer(h, w2_ref, b2_ref)                             # (TB, 256) @ (256, 128)
    h = layer(h, w3_ref, b3_ref)                             # (TB, 128) @ (128, 128)
    h = layer(h, w4_ref, b4_ref)                             # (TB, 128) @ (128, a)
    o_ref[...] = h.astype(o_ref.dtype)                       # single bf16 store


@functools.partial(jax.jit, static_argnames=("batch_tile", "bf16_act"))
def brain_forward(x, params, batch_tile=1024, bf16_act=False):
    """x: (B, s_dim) float32. Returns (B, a_dim) bfloat16.

    params: pre-transposed (in, out) bf16 weights, (1, out) f32 biases.
    """
    B, s_dim = x.shape
    w = [params[f"w{i}"].astype(jnp.bfloat16) for i in range(1, 5)]
    bias_dt = jnp.bfloat16 if bf16_act else jnp.float32
    b = [params[f"b{i}"].astype(bias_dt) for i in range(1, 5)]
    h1, h2, h3 = w[0].shape[1], w[1].shape[1], w[2].shape[1]
    a_dim = w[3].shape[1]

    # Adaptive batch tile: multiple of 16 (bf16 sublane packing), capped at
    # batch_tile, chosen to minimize final-tile padding; force >= 2 grid steps
    # for B >= 32 so dual-TC chips get both cores busy.
    steps = max(pl.cdiv(B, batch_tile), 2 if B >= 32 else 1)
    tb = _round_up(pl.cdiv(B, steps), 16)
    grid = (pl.cdiv(B, tb),)

    def full(arr):
        return pl.BlockSpec(arr.shape, lambda i: (0, 0))

    flops = 2 * B * (s_dim * h1 + h1 * h2 + h2 * h3 + h3 * a_dim)
    bytes_accessed = (
        x.size * 4 + B * a_dim * 2
        + sum(wi.size for wi in w) * 2
        + sum(bi.size for bi in b) * (2 if bf16_act else 4))
    cost = pl.CostEstimate(flops=flops, transcendentals=0,
                           bytes_accessed=bytes_accessed)

    out = pl.pallas_call(
        functools.partial(brain_mlp_kernel, bf16_act=bf16_act),
        out_shape=jax.ShapeDtypeStruct((B, a_dim), jnp.bfloat16),
        grid_spec=pltpu.PrefetchScalarGridSpec(
            num_scalar_prefetch=0,
            grid=grid,
            in_specs=[
                pl.BlockSpec((tb, s_dim), lambda i: (i, 0)),  # x batch tile (f32)
                full(w[0]), full(b[0]),
                full(w[1]), full(b[1]),
                full(w[2]), full(b[2]),
                full(w[3]), full(b[3]),
            ],
            out_specs=pl.BlockSpec((tb, a_dim), lambda i: (i, 0)),
        ),
        compiler_params=pltpu.CompilerParams(
            dimension_semantics=("parallel",)),
        cost_estimate=cost,
    )(x, w[0], b[0], w[1], b[1], w[2], b[2], w[3], b[3])

    return out


def init_brain_params(key, a_dim=64, s_dim=64):
    """PyTorch-Linear-style init: U(-1/sqrt(fan_in), 1/sqrt(fan_in)).

    Weights stored transposed (in_features, out_features) in bf16 (MXU operand
    dtype); biases stored as (1, out_features) f32 rows.
    """
    dims = [(s_dim, 256), (256, 128), (128, 128), (128, a_dim)]
    params = {}
    for idx, (fan_in, fan_out) in enumerate(dims, start=1):
        key, kw, kb = jax.random.split(key, 3)
        bound = fan_in ** -0.5
        wv = jax.random.uniform(kw, (fan_in, fan_out), jnp.float32, -bound, bound)
        bv = jax.random.uniform(kb, (1, fan_out), jnp.float32, -bound, bound)
        params[f"w{idx}"] = wv.astype(jnp.bfloat16)
        params[f"b{idx}"] = bv
    return params


def brain_reference(x, params, bf16_act=False):
    """Pure-JAX reference with the same numerics as the kernel (bf16 matmul
    operands, f32 accumulation, bf16/f32 bias + LeakyReLU, eval-mode dropout,
    bf16 output)."""
    h = x.astype(jnp.bfloat16)
    for i in range(1, 5):
        wi = params[f"w{i}"].astype(jnp.bfloat16)
        bi = params[f"b{i}"]
        acc = jnp.dot(h, wi, preferred_element_type=jnp.float32)
        if bf16_act:
            a = acc.astype(jnp.bfloat16) + bi.astype(jnp.bfloat16)
            h = jnp.maximum(a, a * NEG_SLOPE)
        else:
            a = acc + bi.astype(jnp.float32)
            h = jnp.maximum(a, a * NEG_SLOPE).astype(jnp.bfloat16)
    return h


if __name__ == "__main__":
    key = jax.random.PRNGKey(0)
    k_params, k_x = jax.random.split(key)

    # BATCH not a multiple of the 16-row tile and >= 32: exercises the
    # adaptive tile, multi-step grid and edge-block masking.
    A_DIM, S_DIM, BATCH = 64, 64, 50
    params = init_brain_params(k_params, a_dim=A_DIM, s_dim=S_DIM)
    x = jax.random.normal(k_x, (BATCH, S_DIM), dtype=jnp.float32)

    bf16_act = _has_bf16_vpu()
    out = jax.block_until_ready(brain_forward(x, params, bf16_act=bf16_act))

    ref = brain_reference(x, params, bf16_act=bf16_act)
    assert out.shape == (BATCH, A_DIM), out.shape
    assert out.dtype == jnp.bfloat16, out.dtype
    assert jnp.allclose(out.astype(jnp.float32), ref.astype(jnp.float32),
                        atol=2e-2, rtol=2e-2), "mismatch vs JAX reference"

    print("KERNEL_OK")
</pallas_src>

<mosaic_0001>
module attributes {stable_mosaic.version = 11 : i64} {
  func.func @brain_mlp_kernel(%arg0: i32, %arg1: memref<32x64xf32, #tpu.memory_space<vmem>>, %arg2: memref<64x256xbf16, #tpu.memory_space<vmem>>, %arg3: memref<1x256xbf16, #tpu.memory_space<vmem>>, %arg4: memref<256x128xbf16, #tpu.memory_space<vmem>>, %arg5: memref<1x128xbf16, #tpu.memory_space<vmem>>, %arg6: memref<128x128xbf16, #tpu.memory_space<vmem>>, %arg7: memref<1x128xbf16, #tpu.memory_space<vmem>>, %arg8: memref<128x64xbf16, #tpu.memory_space<vmem>>, %arg9: memref<1x64xbf16, #tpu.memory_space<vmem>>, %arg10: memref<32x64xbf16, #tpu.memory_space<vmem>>) attributes {dimension_semantics = [#tpu.dimension_semantics<parallel>], iteration_bounds = array<i64: 2>, scalar_prefetch = 0 : i64, scratch_operands = 0 : i64, tpu.core_type = #tpu.core_type<tc>, window_params = [{transform_indices = @transform_0, window_bounds = array<i64: 32, 64>}, {pipeline_mode = #tpu.pipeline_mode<synchronous>, transform_indices = @transform_1, window_bounds = array<i64: 64, 256>}, {pipeline_mode = #tpu.pipeline_mode<synchronous>, transform_indices = @transform_2, window_bounds = array<i64: 1, 256>}, {pipeline_mode = #tpu.pipeline_mode<synchronous>, transform_indices = @transform_3, window_bounds = array<i64: 256, 128>}, {pipeline_mode = #tpu.pipeline_mode<synchronous>, transform_indices = @transform_4, window_bounds = array<i64: 1, 128>}, {pipeline_mode = #tpu.pipeline_mode<synchronous>, transform_indices = @transform_5, window_bounds = array<i64: 128, 128>}, {pipeline_mode = #tpu.pipeline_mode<synchronous>, transform_indices = @transform_6, window_bounds = array<i64: 1, 128>}, {pipeline_mode = #tpu.pipeline_mode<synchronous>, transform_indices = @transform_7, window_bounds = array<i64: 128, 64>}, {pipeline_mode = #tpu.pipeline_mode<synchronous>, transform_indices = @transform_8, window_bounds = array<i64: 1, 64>}, {transform_indices = @transform_9, window_bounds = array<i64: 32, 64>}]} {
    %c0 = arith.constant 0 : index
    %c0_0 = arith.constant 0 : index
    %0 = vector.load %arg1[%c0, %c0_0] : memref<32x64xf32, #tpu.memory_space<vmem>>, vector<32x64xf32>
    %1 = arith.truncf %0 : vector<32x64xf32> to vector<32x64xbf16>
    %c0_1 = arith.constant 0 : index
    %c0_2 = arith.constant 0 : index
    %2 = vector.load %arg2[%c0_1, %c0_2] : memref<64x256xbf16, #tpu.memory_space<vmem>>, vector<64x256xbf16>
    %cst = arith.constant dense<0.000000e+00> : vector<32x256xf32>
    %3 = tpu.matmul %1, %2, %cst {dimension_numbers = #tpu.dot_dimension_numbers<[1], [0], [0], [1], [0, 0, 1, 1], [], []>} : vector<32x64xbf16>, vector<64x256xbf16>, vector<32x256xf32> -> vector<32x256xf32>
    %4 = arith.truncf %3 : vector<32x256xf32> to vector<32x256xbf16>
    %c0_3 = arith.constant 0 : index
    %c0_4 = arith.constant 0 : index
    %5 = vector.load %arg3[%c0_3, %c0_4] : memref<1x256xbf16, #tpu.memory_space<vmem>>, vector<1x256xbf16>
    %6 = vector.broadcast %5 : vector<1x256xbf16> to vector<32x256xbf16>
    %7 = arith.addf %4, %6 : vector<32x256xbf16>
    %cst_5 = arith.constant 1.000980e-02 : bf16
    %8 = vector.broadcast %cst_5 : bf16 to vector<32x256xbf16>
    %9 = arith.mulf %7, %8 : vector<32x256xbf16>
    %10 = arith.maximumf %7, %9 : vector<32x256xbf16>
    %c0_6 = arith.constant 0 : index
    %c0_7 = arith.constant 0 : index
    %11 = vector.load %arg4[%c0_6, %c0_7] : memref<256x128xbf16, #tpu.memory_space<vmem>>, vector<256x128xbf16>
    %cst_8 = arith.constant dense<0.000000e+00> : vector<32x128xf32>
    %12 = tpu.matmul %10, %11, %cst_8 {dimension_numbers = #tpu.dot_dimension_numbers<[1], [0], [0], [1], [0, 0, 1, 1], [], []>} : vector<32x256xbf16>, vector<256x128xbf16>, vector<32x128xf32> -> vector<32x128xf32>
    %13 = arith.truncf %12 : vector<32x128xf32> to vector<32x128xbf16>
    %c0_9 = arith.constant 0 : index
    %c0_10 = arith.constant 0 : index
    %14 = vector.load %arg5[%c0_9, %c0_10] : memref<1x128xbf16, #tpu.memory_space<vmem>>, vector<1x128xbf16>
    %15 = vector.broadcast %14 : vector<1x128xbf16> to vector<32x128xbf16>
    %16 = arith.addf %13, %15 : vector<32x128xbf16>
    %cst_11 = arith.constant 1.000980e-02 : bf16
    %17 = vector.broadcast %cst_11 : bf16 to vector<32x128xbf16>
    %18 = arith.mulf %16, %17 : vector<32x128xbf16>
    %19 = arith.maximumf %16, %18 : vector<32x128xbf16>
    %c0_12 = arith.constant 0 : index
    %c0_13 = arith.constant 0 : index
    %20 = vector.load %arg6[%c0_12, %c0_13] : memref<128x128xbf16, #tpu.memory_space<vmem>>, vector<128x128xbf16>
    %cst_14 = arith.constant dense<0.000000e+00> : vector<32x128xf32>
    %21 = tpu.matmul %19, %20, %cst_14 {dimension_numbers = #tpu.dot_dimension_numbers<[1], [0], [0], [1], [0, 0, 1, 1], [], []>} : vector<32x128xbf16>, vector<128x128xbf16>, vector<32x128xf32> -> vector<32x128xf32>
    %22 = arith.truncf %21 : vector<32x128xf32> to vector<32x128xbf16>
    %c0_15 = arith.constant 0 : index
    %c0_16 = arith.constant 0 : index
    %23 = vector.load %arg7[%c0_15, %c0_16] : memref<1x128xbf16, #tpu.memory_space<vmem>>, vector<1x128xbf16>
    %24 = vector.broadcast %23 : vector<1x128xbf16> to vector<32x128xbf16>
    %25 = arith.addf %22, %24 : vector<32x128xbf16>
    %cst_17 = arith.constant 1.000980e-02 : bf16
    %26 = vector.broadcast %cst_17 : bf16 to vector<32x128xbf16>
    %27 = arith.mulf %25, %26 : vector<32x128xbf16>
    %28 = arith.maximumf %25, %27 : vector<32x128xbf16>
    %c0_18 = arith.constant 0 : index
    %c0_19 = arith.constant 0 : index
    %29 = vector.load %arg8[%c0_18, %c0_19] : memref<128x64xbf16, #tpu.memory_space<vmem>>, vector<128x64xbf16>
    %cst_20 = arith.constant dense<0.000000e+00> : vector<32x64xf32>
    %30 = tpu.matmul %28, %29, %cst_20 {dimension_numbers = #tpu.dot_dimension_numbers<[1], [0], [0], [1], [0, 0, 1, 1], [], []>} : vector<32x128xbf16>, vector<128x64xbf16>, vector<32x64xf32> -> vector<32x64xf32>
    %31 = arith.truncf %30 : vector<32x64xf32> to vector<32x64xbf16>
    %c0_21 = arith.constant 0 : index
    %c0_22 = arith.constant 0 : index
    %32 = vector.load %arg9[%c0_21, %c0_22] : memref<1x64xbf16, #tpu.memory_space<vmem>>, vector<1x64xbf16>
    %33 = vector.broadcast %32 : vector<1x64xbf16> to vector<32x64xbf16>
    %34 = arith.addf %31, %33 : vector<32x64xbf16>
    %cst_23 = arith.constant 1.000980e-02 : bf16
    %35 = vector.broadcast %cst_23 : bf16 to vector<32x64xbf16>
    %36 = arith.mulf %34, %35 : vector<32x64xbf16>
    %37 = arith.maximumf %34, %36 : vector<32x64xbf16>
    %c0_24 = arith.constant 0 : index
    %c0_25 = arith.constant 0 : index
    %38 = vector.load %arg10[%c0_24, %c0_25] : memref<32x64xbf16, #tpu.memory_space<vmem>>, vector<32x64xbf16>
    tpu.vector_store %arg10[%c0_24, %c0_25], %37 {strides = array<i32>} : memref<32x64xbf16, #tpu.memory_space<vmem>>, vector<32x64xbf16>,
    return
  }
  func.func @transform_0(%arg0: i32) -> (i32, i32) {
    %c0_i32 = arith.constant 0 : i32
    %c0_i32_0 = arith.constant 0 : i32
    return %arg0, %c0_i32 : i32, i32
  }
  func.func @transform_1(%arg0: i32) -> (i32, i32) {
    %c0_i32 = arith.constant 0 : i32
    %c0_i32_0 = arith.constant 0 : i32
    %c0_i32_1 = arith.constant 0 : i32
    return %c0_i32, %c0_i32_0 : i32, i32
  }
  func.func @transform_2(%arg0: i32) -> (i32, i32) {
    %c0_i32 = arith.constant 0 : i32
    %c0_i32_0 = arith.constant 0 : i32
    %c0_i32_1 = arith.constant 0 : i32
    return %c0_i32, %c0_i32_0 : i32, i32
  }
  func.func @transform_3(%arg0: i32) -> (i32, i32) {
    %c0_i32 = arith.constant 0 : i32
    %c0_i32_0 = arith.constant 0 : i32
    %c0_i32_1 = arith.constant 0 : i32
    return %c0_i32, %c0_i32_0 : i32, i32
  }
  func.func @transform_4(%arg0: i32) -> (i32, i32) {
    %c0_i32 = arith.constant 0 : i32
    %c0_i32_0 = arith.constant 0 : i32
    %c0_i32_1 = arith.constant 0 : i32
    return %c0_i32, %c0_i32_0 : i32, i32
  }
  func.func @transform_5(%arg0: i32) -> (i32, i32) {
    %c0_i32 = arith.constant 0 : i32
    %c0_i32_0 = arith.constant 0 : i32
    %c0_i32_1 = arith.constant 0 : i32
    return %c0_i32, %c0_i32_0 : i32, i32
  }
  func.func @transform_6(%arg0: i32) -> (i32, i32) {
    %c0_i32 = arith.constant 0 : i32
    %c0_i32_0 = arith.constant 0 : i32
    %c0_i32_1 = arith.constant 0 : i32
    return %c0_i32, %c0_i32_0 : i32, i32
  }
  func.func @transform_7(%arg0: i32) -> (i32, i32) {
    %c0_i32 = arith.constant 0 : i32
    %c0_i32_0 = arith.constant 0 : i32
    %c0_i32_1 = arith.constant 0 : i32
    return %c0_i32, %c0_i32_0 : i32, i32
  }
  func.func @transform_8(%arg0: i32) -> (i32, i32) {
    %c0_i32 = arith.constant 0 : i32
    %c0_i32_0 = arith.constant 0 : i32
    %c0_i32_1 = arith.constant 0 : i32
    return %c0_i32, %c0_i32_0 : i32, i32
  }
  func.func @transform_9(%arg0: i32) -> (i32, i32) {
    %c0_i32 = arith.constant 0 : i32
    %c0_i32_0 = arith.constant 0 : i32
    return %arg0, %c0_i32 : i32, i32
  }
}

</mosaic_0001>

<bundles_post_ra>
// kernel: brain_forward.1
= control target key start
LH: loop header
LB: loop body
LE: loop exit
PB: predicated region body
PF: predicated region fallthrough
CT: control target
= control target key end

     0   :  { %s1988_s0 = inlined_call_operand.hbm [shape: f32[50,64], index: 0, kind: input, shape index: {}]   ;;  %s1989_s1 = inlined_call_operand.hbm [shape: bf16[64,256], index: 1, kind: input, shape index: {}]   ;;  %s1990_s2 = inlined_call_operand.vmem [shape: bf16[1,256], index: 2, kind: input, shape index: {}]   ;;  %s1991_s3 = inlined_call_operand.vmem [shape: bf16[256,128], index: 3, kind: input, shape index: {}]   ;;  %s1992_s4 = inlined_call_operand.vmem [shape: bf16[1,128], index: 4, kind: input, shape index: {}]   ;;  %s1993_s5 = inlined_call_operand.hbm [shape: bf16[128,128], index: 5, kind: input, shape index: {}]   ;;  %s1994_s6 = inlined_call_operand.vmem [shape: bf16[1,128], index: 6, kind: input, shape index: {}]   ;;  %s1995_s7 = inlined_call_operand.vmem [shape: bf16[128,64], index: 7, kind: input, shape index: {}]   ;;  %s1996_s8 = inlined_call_operand.vmem [shape: bf16[1,64], index: 8, kind: input, shape index: {}]   ;;  %s1997_s9 = inlined_call_operand.hbm [shape: bf16[50,64], index: 9, kind: output, shape index: {}]  }
   0x1   :  { %2006 = sst [smem:[#allocation16_spill]] %s1997_s9 }
   0x2   :  { %14 = vsyncpa [#allocation3], 0 }
   0x3   :  { %16 = vsyncpa [#allocation3 + $0x1], 0 }
   0x4   :  { %17 = vsyncpa [#allocation6], 0 }
   0x5   :  { %18 = vsyncpa [#allocation4], 0 }
   0x6   :  { %20 = vsyncpa [#allocation4 + $0x1], 0  ;;  %s1645_s30 = smov 0   ;;  %s1647_s10 = smov 0  }
   0x7   :  { %s1649_s11 = smov 0   ;;  %s1651_s12 = smov 0  }
   0x8 LB: > { %2007 = sst [smem:[#allocation12_spill]] %s1567_s30  ;;  %s1666_s13 = sadd.s32 4294967295, %s1579_s12   ;;  %s1579_s12 = sphi %s1651_s12, %s2027_s12   ;;  %s1575_s11 = sphi %s1649_s11, %s2031_s11   ;;  %s1571_s10 = sphi %s1647_s10, %s2030_s10   ;;  %s1567_s30 = sphi %s1645_s30, %s2029_s30  }
   0x9   : > { %s1148_s14 = sadd.s32 4294967294, %s1579_s12   ;;  %s1670_s15 = sadd.s32 1, %s1579_s12  }
   0xa   : > { %2008 = sst [smem:[#allocation13_spill]] %s1670_s15  ;;  %s33_s16 = sadd.s32 1, %s1575_s11 }
   0xb   : > { %s30_s17 = ssub.s32 %s1579_s12, %s1670_s15  ;;  %p40_p0 = scmp.ne.s32.totalorder %s1575_s11, %s1571_s10 }
   0xc   : > { %p31_p1 = scmp.eq.s32.totalorder %s30_s17, 0  ;;  %p41_p2 = scmp.eq.s32.totalorder %s1579_s12, 0 }
   0xd   : > { %p46_p3 = scmp.ne.s32.totalorder %s1571_s10, %s1567_s30  ;;  %p2000_p4 = scmp.eq.s32.totalorder %s1666_s13, 0 }
   0xe   : > { %s1682_s18 = scalar_select %p31_p1, %s1575_s11, %s33_s16  }
   0xf   : > { %p1684_p5 = por %p41_p2, %p40_p0  ;;  %p1690_p6 = por %p2000_p4, %p46_p3 }
  0x10   : > { %2009 = sst [smem:[#allocation14_spill]] %s1682_s18  ;;  %p238_p7 = scmp.eq.s32.totalorder %s1666_s13, 1 }
  0x11   : > { %s2010_s19 = scalar_select %p1684_p5, 1, 0 }
  0x12   : > { %s2011_s20 = scalar_select %p1690_p6, 1, 0 }
  0x13   : > { %p244_p8 = scmp.eq.s32.totalorder %s1148_s14, 1  ;;  %p1149_p9 = scmp.ge.s32.totalorder %s1579_s12, 1 }
  0x14   : > { %p251_p10 = scmp.lt.s32.totalorder %s1579_s12, 3  ;;  %p1697_p11 = por %p238_p7, %p40_p0 }
  0x15   : > { %p1701_p12 = por %p244_p8, %p46_p3  ;;  %s1581_s24 = smov [#allocation5]  }
  0x16   : > { %s2012_s21 = scalar_select %p1697_p11, 1, 0 }
  0x17   : > { %s2013_s22 = scalar_select %p1701_p12, 1, 0 }
  0x18   : > { %p1705_p13 = pnand %p1149_p9, %p251_p10  ;;  %s263_s25 = sshll.u32 %s1581_s24, 4  ;;  %s264_s25 = int_to_ptr.vmem [resolvable:$true] %s263_s25 }
  0x19   : > { %2014 = sst [smem:[#allocation15_spill]] %s2013_s22  ;;  %s1582_s27 = smov [#allocation7]  }
  0x1a   : > { %s2015_s23 = scalar_select %p1705_p13, 1, 0 }
  0x1b   : > { %p1321_p1 = pneg %p1705_p13  ;;  %s285_s28 = sshll.u32 %s1582_s27, 4  ;;  %s1717_s28 = int_to_ptr.vmem [resolvable:$true] %s285_s28 }
  0x1c   : > { %s1425_s16 = scalar_lea.hbm %s1989_s1, 1024 }
  0x1d   : > { %p1713_p2 = pnand %p1321_p1, %p2000_p4  ;;  %p1426_p0 = scmp.ne.s32.totalorder %s1989_s1, %s1425_s16 }
  0x1e   : > { %p1432_p9 = scmp.lt.u32.totalorder %s1425_s16, %s1989_s1 }
  0x1f   : > { %p1427_p3 = pneg %p1713_p2 }
  0x21   : > { %p1428_p7 = pnand %p1427_p3, %p1426_p0 }
  0x23   : > { %p1429_p8 = pneg %p1428_p7 }
  0x25   : > { %p1434_p10 = pnand %p1432_p9, %p1429_p8 }
  0x27   : > { %1437 = shalt.err (!%p1434_p10)
}
  0x28   : > { %s1438_s27 = scalar_lea.vmem %s264_s25, 1024  ;;  %p1446_p11 = scmp.lt.s32.totalorder %s264_s25, %s264_s25 }
  0x29   : > { %p1439_p1 = scmp.ne.s32.totalorder %s264_s25, %s1438_s27  ;;  %p1447_p6 = scmp.lt.s32.totalorder %s1438_s27, %s1438_s27 }
  0x2b   : > { %p1441_p4 = pnand %p1439_p1, %p1427_p3  ;;  %p1448_p13 = por %p1447_p6, %p1446_p11 }
  0x2d   : > { %p1442_p12 = pneg %p1441_p4 }
  0x2f   : > { %p1449_p5 = pnand %p1448_p13, %p1442_p12 }
  0x31   : > { %1452 = shalt.err (!%p1449_p5)
}
  0x32   : > { %s1583_s18 = smov 128   ;;  %s1584_s29 = smov 8  }
  0x33   : > { %1324 = dma.hbm_to_vmem [thread:$0]  (!%p1713_p2), %s1989_s1, 1024, %s264_s25, [#allocation6], %s1583_s18, %s1583_s18, %s1584_s29  }
  0x34   : > { %s1453_s24 = scalar_lea.hbm %s1993_s5, 1024 }
  0x35   : > { %p1454_p4 = scmp.ne.s32.totalorder %s1993_s5, %s1453_s24  ;;  %p1460_p11 = scmp.lt.u32.totalorder %s1453_s24, %s1993_s5 }
  0x37   : > { %p1456_p5 = pnand %p1454_p4, %p1427_p3 }
  0x39   : > { %p1457_p6 = pneg %p1456_p5 }
  0x3b   : > { %p1462_p12 = pnand %p1460_p11, %p1457_p6 }
  0x3d   : > { %1465 = shalt.err (!%p1462_p12)
}
  0x3e   : > { %s1466_s25 = scalar_lea.vmem %s1717_s28, 1024  ;;  %p1474_p8 = scmp.lt.s32.totalorder %s1717_s28, %s1717_s28 }
  0x3f   : > { %p1467_p13 = scmp.ne.s32.totalorder %s1717_s28, %s1466_s25  ;;  %p1475_p9 = scmp.lt.s32.totalorder %s1466_s25, %s1466_s25 }
  0x41   : > { %p1469_p0 = pnand %p1467_p13, %p1427_p3  ;;  %p1476_p10 = por %p1475_p9, %p1474_p8 }
  0x43   : > { %p1470_p7 = pneg %p1469_p0 }
  0x45   : > { %p1477_p1 = pnand %p1476_p10, %p1470_p7 }
  0x47   : > { %1480 = shalt.err (!%p1477_p1)
}
  0x48   : > { %s1585_s9 = smov 64   ;;  %s1586_s30 = smov 4  }
  0x49   : > { %1327 = dma.hbm_to_vmem [thread:$0]  (!%p1713_p2), %s1993_s5, 1024, %s1717_s28, [#allocation6], %s1585_s9, %s1585_s9, %s1586_s30  }
  0x4a   : > { %p1152_p4 = scmp.ge.s32.totalorder %s1579_s12, 2 }
  0x4b   : > { %p2017_p3 = scmp.ne.s32.totalorder (!%p1152_p4), %s2010_s19, 0 }
  0x4c   : > { %304 = sbr.rel (%p1152_p4) target bundleno = 118 (0x76), region = 48 }
  0x53   : > { %307 = sbr.rel (!%p2017_p3) target bundleno = 118 (0x76), region = 52  ;;  %s308_s29 = sand.u32 (%p2017_p3), 1, %s1575_s11  }
  0x54   : > { %s1154_s15 = sshll.u32 (%p2017_p3), %s1579_s12, 2  ;;  %s1153_s14 = sshll.u32 (%p2017_p3), %s308_s29, 5 }
  0x55   : > { %s314_s16 = ssub.s32 (%p2017_p3), 7, %s1154_s15  ;;  %s1776_s17 = scalar_lea.sflag (%p2017_p3), [#allocation3], %s308_s29 }
  0x56   : > { %p315_p5 = scmp.lt.s32.totalorder (%p2017_p3), %s314_s16, 4  ;;  %s312_s24 = scalar_lea.vmem (%p2017_p3), [#allocation2], %s1153_s14 }
  0x5a   : > { %s2033_s16 = smov (!%p315_p5, %s314_s16), 4 }
  0x5b   : > { %s1773_s26 = sshll.u32 %s2033_s16, 7 }
  0x5c   : > { %s319_s28 = ssub.s32 512, %s1773_s26 }
  0x5d   : > { %320 = vsyncadd %s1776_s17, %s319_s28  ;;  %p1156_p2 = scmp.ne.s32.totalorder %s1773_s26, 0  ;;  %s1221_s19 = sshll.u32 %s1579_s12, 9 }
  0x5e   : > { %s1784_s9 = scalar_lea.hbm %s1988_s0, %s1221_s19  ;;  %s325_s30 = sshll.u32 %s312_s24, 4  ;;  %s1786_s30 = int_to_ptr.vmem [resolvable:$true] %s325_s30 }
  0x5f   : > { %s1481_s22 = scalar_lea.hbm %s1784_s9, %s1773_s26  ;;  %s1485_s15 = scalar_lea.hbm %s1988_s0, 896 }
  0x60   : > { %p1482_p6 = scmp.ne.s32.totalorder %s1784_s9, %s1481_s22  ;;  %p1486_p13 = scmp.lt.u32.totalorder %s1784_s9, %s1988_s0 }
  0x61   : > { %p1487_p0 = scmp.lt.u32.totalorder %s1485_s15, %s1481_s22  ;;  %p1489_p8 = scmp.lt.u32.totalorder %s1481_s22, %s1784_s9 }
  0x62   : > { %p1483_p11 = pnand %p1482_p6, %p1156_p2 }
  0x63   : > { %p1488_p7 = por %p1487_p0, %p1486_p13 }
  0x64   : > { %p1484_p12 = pneg %p1483_p11 }
  0x65   : > { %p1490_p9 = por %p1489_p8, %p1488_p7 }
  0x67   : > { %p1491_p10 = pnand %p1490_p9, %p1484_p12 }
  0x69   : > { %1494 = shalt.err (!%p1491_p10)
}
  0x6a   : > { %s1495_s28 = scalar_lea.vmem %s1786_s30, %s1773_s26  ;;  %s1587_s24 = smov [#allocation2]  }
  0x6b   : > { %p1496_p1 = scmp.ne.s32.totalorder %s1786_s30, %s1495_s28  ;;  %s1499_s19 = sshll.u32 %s1587_s24, 4  ;;  %s1500_s19 = int_to_ptr.vmem [resolvable:$false] %s1499_s19 }
  0x6c   : > { %s1501_s27 = scalar_lea.vmem %s1500_s19, 1024  ;;  %p1502_p6 = scmp.lt.s32.totalorder %s1786_s30, %s1500_s19 }
  0x6d   : > { %p1497_p3 = pnand %p1496_p1, %p1156_p2  ;;  %p1503_p11 = scmp.lt.s32.totalorder %s1501_s27, %s1495_s28 }
  0x6f   : > { %p1498_p5 = pneg %p1497_p3  ;;  %p1504_p13 = por %p1503_p11, %p1502_p6 }
  0x71   : > { %p1505_p0 = pnand %p1504_p13, %p1498_p5 }
  0x73   : > { %1508 = shalt.err (!%p1505_p0)
}
  0x74   : > { %s1588_s25 = smov 128   ;;  %s1589_s22 = smov 8  }
  0x75   : > { %331 = dma.hbm_to_vmem [thread:$0]  (%p1156_p2), %s1784_s9, %s1773_s26, %s1786_s30, %s1776_s17, %s1588_s25, %s1588_s25, %s1589_s22  }
  0x76 PF: > { %p2018_p12 = scmp.ne.s32.totalorder %s2015_s23, 0 }
  0x77   : > { %s1816_s18 = sand.u32 (!%p2018_p12), 1, %s1571_s10   ;;  %p2019_p7 = scmp.ne.s32.totalorder (!%p2018_p12), %s2011_s20, 0 }
  0x78   : > { %337 = sbr.rel (%p2018_p12) target bundleno = 1084 (0x43c), region = 56  ;;  %s1161_s29 = sshll.u32 (!%p2018_p12), %s1816_s18, 5 }
  0x79   : > { %s340_s15 = scalar_lea.sflag (!%p2018_p12), [#allocation3], %s1816_s18  ;;  %s1820_s14 = scalar_lea.vmem (!%p2018_p12), [#allocation2], %s1161_s29 }
  0x7f   : > { %1554 = dma.done.wait (%p2019_p7), %s340_s15, 512  }
  0x80   : > { %1556 = vsyncadd (%p2019_p7), %s340_s15, 4294966784  ;;  %p2020_p2 = scmp.eq.s32.totalorder %s1666_s13, 0 }
  0x82   : > { %1558 = dma.done.wait (%p2020_p2), [#allocation6], 2048   ;;  %p2021_p8 = pmov %p2020_p2 }
  0x83   : > { %v1590_v0 = vmov 0   ;;  %v1381_v1 = vld [vmem:[#allocation5 + $0x4] ss:$8 sps:$4 sm:$0xff]   ;;  %v1383_v2 = vld [vmem:[#allocation5] ss:$8 sps:$4 sm:$0xff]   ;;  %v1397_v15 = vld [vmem:[%s1991_s3 + $0x50] sm:$0xff]   ;;  %v529_v36 = vlaneseq }
  0x84   : > { %1560 = vsyncadd (%p2021_p8), [#allocation6], 4294965248  ;;  %491 = vmatprep.mubr.bf16.mxu0 %v1590_v0  ;;  %459 = vmatprep.subr.bf16.mxu0 %v1381_v1  ;;  %v1384_v3 = vld [vmem:[#allocation5 + $0x14] ss:$8 sps:$4 sm:$0xff]   ;;  %v1386_v4 = vld [vmem:[#allocation5 + $0x10] ss:$8 sps:$4 sm:$0xff]  }
  0x85   : > { %460 = vmatpush1.bf16.msra.mxu0 %v1383_v2  ;;  %v1387_v5 = vld [vmem:[#allocation5 + $0x24] ss:$8 sps:$4 sm:$0xff]   ;;  %v1389_v6 = vld [vmem:[#allocation5 + $0x20] ss:$8 sps:$4 sm:$0xff]   ;;  %v1390_v7 = vld [vmem:[#allocation5 + $0x34] ss:$8 sps:$4 sm:$0xff]  }
  0x86   : > { %461 = vmatprep.subr.bf16.mxu0 %v1384_v3  ;;  %v1393_v8 = vld [vmem:[%s1991_s3 + $0x40] sm:$0xff]   ;;  %v1392_v10 = vld [vmem:[#allocation5 + $0x30] ss:$8 sps:$4 sm:$0xff]   ;;  %v399_v12 = vld [vmem:[%s1820_s14 + $0x8] sm:$0xff]  ;;  %vm452_vm0 = vcmask 523264   ;;  %v530_v38 = vshrl.u32 %v529_v36, 7 }
  0x87   : > { %v1394_v9 = vld [vmem:[%s1991_s3] sm:$0xff]   ;;  %1223 = vmatprep.subr.bf16.mxu1 %v1393_v8  ;;  %v1395_v13 = vld [vmem:[%s1991_s3 + $0x48] sm:$0xff]   ;;  %v1398_v17 = vld [vmem:[%s1991_s3 + $0x10] sm:$0xff]   ;;  %v1591_v34 = vmov 1966171168   ;;  %s1164_s24 = sshll.u32 %s1816_s18, 4 }
  0x88   : > { %v398_v11 = vld [vmem:[%s1820_s14] sm:$0xff]  ;;  %1224 = vmatpush3.bf16.msra.mxu1 %v1394_v9  ;;  %v1396_v14 = vld [vmem:[%s1991_s3 + $0x8] sm:$0xff]   ;;  %v1399_v18 = vld [vmem:[%s1991_s3 + $0x58] sm:$0xff]   ;;  %v527_v35 = vunpack.c.l.s4 %v1591_v34  ;;  %v1885_v45 = vsub.s32 0, %v530_v38  ;;  %vm1031_vm1 = vcmask 519168   ;;  %s385_s19 = scalar_lea.vmem [#allocation8], %s1164_s24 }
  0x89   : > { %462 = vmatpush1.bf16.msra.mxu0 %v1386_v4  ;;  %1225 = vmatprep.subr.bf16.mxu1 %v1395_v13  ;;  %v402_v16 = vpack.c.bf16 %v399_v12, %v398_v11  ;;  %v1400_v19 = vld [vmem:[%s1991_s3 + $0x18] sm:$0xff]   ;;  %v400_v20 = vld [vmem:[%s1820_s14 + $0x10] sm:$0xff]  ;;  %v1401_v22 = vld [vmem:[%s1991_s3 + $0x60] sm:$0xff]   ;;  %s1037_s27 = scalar_lea.sflag [#allocation4], %s1816_s18  ;;  %p2022_p9 = scmp.ne.s32.totalorder %s2012_s21, 0 }
  0x8a   : > { %463 = vmatprep.subr.bf16.mxu0 %v1387_v5  ;;  %v401_v21 = vld [vmem:[%s1820_s14 + $0x18] sm:$0xff]  ;;  %v1402_v23 = vld [vmem:[%s1991_s3 + $0x20] sm:$0xff]   ;;  %v1403_v25 = vld [vmem:[%s1991_s3 + $0x68] sm:$0xff]   ;;  %v528_v37 = vunpack.c.0.s8 %v527_v35  ;;  %s1213_s25 = sshll.u32 (%p2022_p9), %s1666_s13, 2 }
  0x8b   : > { %v403_v24 = vpack.c.bf16 %v401_v21, %v400_v20  ;;  %v1404_v26 = vld [vmem:[%s1991_s3 + $0x28] sm:$0xff]   ;;  %v1405_v27 = vld [vmem:[%s1991_s3 + $0x70] sm:$0xff]   ;;  %v1407_v29 = vld [vmem:[%s1991_s3 + $0x78] sm:$0xff]   ;;  %s1045_s22 = ssub.s32 (%p2022_p9), 7, %s1213_s25 }
  0x8c   : > { %1226 = vmatpush3.bf16.msra.mxu1 %v1396_v14  ;;  %v1406_v28 = vld [vmem:[%s1991_s3 + $0x30] sm:$0xff]   ;;  %v1408_v30 = vld [vmem:[%s1991_s3 + $0x38] sm:$0xff]   ;;  %v1409_v31 = vld [vmem:[#allocation7] sm:$0xff]   ;;  %v531_v40 = vsub.s32 %v528_v37, %v530_v38  ;;  %p1046_p10 = scmp.lt.s32.totalorder (%p2022_p9), %s1045_s22, 4 }
  0x8d   : > { %464 = vmatpush1.bf16.msra.mxu0 %v1389_v6  ;;  %1227 = vmatprep.subr.bf16.mxu1 %v1397_v15  ;;  %v1410_v32 = vld [vmem:[#allocation7 + $0x8] sm:$0xff]   ;;  %v1411_v33 = vld [vmem:[#allocation7 + $0x10] sm:$0xff]   ;;  %v1175_v39 = vld.sshfl [vmem:[%s1990_s2] sm:$0x11 pattern:$0x75316420] }
  0x8e   : > { %465 = vmatprep.subr.bf16.mxu0 %v1390_v7  ;;  %v525_v41 = vcombine.high %v1175_v39, %v1175_v39  ;;  %v532_v42 = vrot.slane %v1175_v39, %v531_v40  ;;  %v1412_v9 = vld [vmem:[#allocation7 + $0x18] sm:$0xff]   ;;  %v1414_v11 = vld [vmem:[#allocation7 + $0x28] sm:$0xff]   ;;  %v1415_v12 = vld [vmem:[#allocation7 + $0x30] sm:$0xff]  }
  0x8f   : > { %v1416_v13 = vld [vmem:[#allocation7 + $0x38] sm:$0xff]   ;;  %v1417_v14 = vld [vmem:[%s1995_s7] sm:$0xff]   ;;  %v1418_v15 = vld [vmem:[%s1995_s7 + $0x8] sm:$0xff]  }
  0x90   : > { %1228 = vmatpush3.bf16.msra.mxu1 %v1398_v17  ;;  %v539_v43 = vrot.slane %v525_v41, %v531_v40  ;;  %v541_v44 = vpack.i.b16 %v532_v42, %v532_v42  ;;  %v1420_v17 = vld [vmem:[%s1995_s7 + $0x18] sm:$0xff]   ;;  %v1422_v42 = vld [vmem:[%s1995_s7 + $0x28] sm:$0xff]  }
  0x91   : > { %466 = vmatpush1.bf16.msra.mxu0 %v1392_v10  ;;  %1229 = vmatprep.subr.bf16.mxu1 %v1399_v18  ;;  %v1413_v10 = vld [vmem:[#allocation7 + $0x20] sm:$0xff]  }
  0x92   : > { %1271 = vmatprep.subr.bf16.mxu0 %v1409_v31  ;;  %v548_v46 = vpack.i.b16 %v539_v43, %v539_v43  ;;  %v546_v49 = vrot.slane %v541_v44, %v1885_v45  ;;  %v1421_v18 = vld [vmem:[%s1995_s7 + $0x20] sm:$0xff]   ;;  %v1423_v43 = vld [vmem:[%s1995_s7 + $0x30] sm:$0xff]   ;;  %v1424_v44 = vld [vmem:[%s1995_s7 + $0x38] sm:$0xff]  }
  0x94   : > { %1173 = vmatmul.mubr.msk.bf16.vlgmr.msra.gmra.mrb[0].mxu0 %vm452_vm0, %v402_v16  ;;  %1230 = vmatpush3.bf16.msra.mxu1 %v1400_v19  ;;  %v553_v51 = vrot.slane %v548_v46, %v1885_v45  ;;  %v1419_v16 = vld [vmem:[%s1995_s7 + $0x10] sm:$0xff]   ;;  %v745_v19 = vld [vmem:[%s1992_s4] sm:$0x1] }
  0x95   : > { %501 = vmatprep.mubr.bf16.mxu0 %v1590_v0  ;;  %1231 = vmatprep.subr.bf16.mxu1 %v1401_v22  ;;  %v747_v21 = vpack.i.b16 %v745_v19, %v745_v19  ;;  %v874_v46 = vld [vmem:[%s1994_s6] sm:$0x1] }
  0x96   : > { %1272 = vmatpush3.bf16.msra.mxu0 %v1409_v31 }
  0x97   : > { %1273 = vmatprep.subr.bf16.mxu0 %v1410_v32 }
  0x98   : > { %1232 = vmatpush3.bf16.msra.mxu1 %v1402_v23 }
  0x99   : > { %1233 = vmatprep.subr.bf16.mxu1 %v1403_v25 }
  0x9a   : > { %1274 = vmatpush3.bf16.msra.mxu0 %v1410_v32 }
  0x9b   : > { %1275 = vmatprep.subr.bf16.mxu0 %v1411_v33 }
  0x9c   : > { %1174 = vmatmul.mubr.msk.bf16.gmra.mrb[4].mxu0 %vm452_vm0, %v403_v24  ;;  %1234 = vmatpush3.bf16.msra.mxu1 %v1404_v26 }
  0x9d   : > { %1235 = vmatprep.subr.bf16.mxu1 %v1405_v27  ;;  %v752_v27 = vrot.slane %v747_v21, %v1885_v45 }
  0x9e   : > { %1276 = vmatpush3.bf16.msra.mxu0 %v1411_v33 }
  0x9f   : > { %1277 = vmatprep.subr.bf16.mxu0 %v1412_v9 }
  0xa0   : > { %1236 = vmatpush3.bf16.msra.mxu1 %v1406_v28 }
  0xa1   : > { %1237 = vmatprep.subr.bf16.mxu1 %v1407_v29 }
  0xa2   : > { %1278 = vmatpush3.bf16.msra.mxu0 %v1412_v9 }
  0xa3   : > { %1279 = vmatprep.subr.bf16.mxu0 %v1413_v10 }
  0xa4   : > { %1238 = vmatpush3.bf16.msra.mxu1 %v1408_v30 }
  0xa5   : > { %1291 = vmatprep.subr.bf16.mxu1 %v1417_v14 }
  0xa6   : > { %1280 = vmatpush3.bf16.msra.mxu0 %v1413_v10 }
  0xa7   : > { %1281 = vmatprep.subr.bf16.mxu0 %v1414_v11 }
  0xaa   : > { %1282 = vmatpush3.bf16.msra.mxu0 %v1414_v11 }
  0xab   : > { %1283 = vmatprep.subr.bf16.mxu0 %v1415_v12 }
  0xae   : > { %1284 = vmatpush3.bf16.msra.mxu0 %v1415_v12 }
  0xaf   : > { %1285 = vmatprep.subr.bf16.mxu0 %v1416_v13 }
  0xb2   : > { %1286 = vmatpush3.bf16.msra.mxu0 %v1416_v13 }
 0x167   : > { %v493_v47 = vpop.f32.mrb[0].mxu0 }
 0x168   : > { %v495_v48 = vpop.f32.mrb[1].mxu0 }
 0x169   : > { %v497_v50 = vpop.f32.mrb[2].mxu0 }
 0x16a   : > { %v512_v52 = vpack.c.bf16 %v497_v50, %v493_v47  ;;  %v499_v53 = vpop.f32.mrb[3].mxu0  ;;  %v876_v47 = vpack.i.b16 %v874_v46, %v874_v46 }
 0x16b   : > { %v513_v54 = vpack.c.bf16 %v499_v53, %v495_v48 }
 0x16c   : > { %v554_v55 = vadd.bf16 %v546_v49, %v512_v52  ;;  %v881_v50 = vrot.slane %v876_v47, %v1885_v45 }
 0x16d   : > { %v555_v56 = vadd.bf16 %v553_v51, %v513_v54 }
 0x16e   : > { %v558_v57 = vmul.bf16 1009007652, %v554_v55 }
 0x16f   : > { %v503_v58 = vpop.f32.mrb[4].mxu0  ;;  %v559_v59 = vmul.bf16 1009007652, %v555_v56 }
 0x170   : > { %v505_v60 = vpop.f32.mrb[5].mxu0  ;;  %v562_v1 = vmax.bf16 %v558_v57, %v554_v55 }
 0x171   : > { %v507_v61 = vpop.f32.mrb[6].mxu0  ;;  %v563_v62 = vmax.bf16 %v559_v59, %v555_v56 }
 0x172   : > { %v514_v63 = vpack.c.bf16 %v507_v61, %v503_v58  ;;  %v509_v0 = vpop.f32.mrb[7].mxu0  ;;  %v1003_v61 = vld [vmem:[%s1996_s8] sm:$0x1] }
 0x173   : > { %v515_v2 = vpack.c.bf16 %v509_v0, %v505_v60  ;;  %726 = vmatprep.mubr.bf16.mxu1 %v563_v62  ;;  %v1005_v62 = vpack.i.b16 %v1003_v61, %v1003_v61 }
 0x174   : > { %v556_v3 = vadd.bf16 %v546_v49, %v514_v63  ;;  %727 = vmatmul.mubr.bf16.vlgmr.msra.gmra.mrb[0].mxu1 %v562_v1 }
 0x175   : > { %v557_v4 = vadd.bf16 %v553_v51, %v515_v2  ;;  %1292 = vmatpush3.bf16.msra.mxu1 %v1417_v14  ;;  %v1010_v1 = vrot.slane %v1005_v62, %v1885_v45 }
 0x176   : > { %v560_v5 = vmul.bf16 1009007652, %v556_v3  ;;  %1293 = vmatprep.subr.bf16.mxu1 %v1418_v15 }
 0x177   : > { %v561_v6 = vmul.bf16 1009007652, %v557_v4 }
 0x178   : > { %v564_v8 = vmax.bf16 %v560_v5, %v556_v3 }
 0x179   : > { %v565_v7 = vmax.bf16 %v561_v6, %v557_v4  ;;  %1294 = vmatpush3.bf16.msra.mxu1 %v1418_v15 }
 0x17a   : > { %1295 = vmatprep.subr.bf16.mxu1 %v1419_v16 }
 0x17b   : > { %734 = vmatprep.mubr.bf16.mxu1 %v565_v7 }
 0x17c   : > { %735 = vmatmul.mubr.bf16.gmra.mrb[4].mxu1 %v564_v8 }
 0x17d   : > { %1296 = vmatpush3.bf16.msra.mxu1 %v1419_v16 }
 0x17e   : > { %1297 = vmatprep.subr.bf16.mxu1 %v1420_v17 }
 0x181   : > { %1298 = vmatpush3.bf16.msra.mxu1 %v1420_v17 }
 0x182   : > { %1299 = vmatprep.subr.bf16.mxu1 %v1421_v18 }
 0x185   : > { %1300 = vmatpush3.bf16.msra.mxu1 %v1421_v18 }
 0x186   : > { %1301 = vmatprep.subr.bf16.mxu1 %v1422_v42 }
 0x189   : > { %1302 = vmatpush3.bf16.msra.mxu1 %v1422_v42 }
 0x18a   : > { %1303 = vmatprep.subr.bf16.mxu1 %v1423_v43 }
 0x18d   : > { %1304 = vmatpush3.bf16.msra.mxu1 %v1423_v43 }
 0x18e   : > { %1305 = vmatprep.subr.bf16.mxu1 %v1424_v44 }
 0x191   : > { %1306 = vmatpush3.bf16.msra.mxu1 %v1424_v44 }
 0x247   : > { %v1239_v20 = vpop.f32.mrb[0].mxu1 }
 0x248   : > { %v1240_v22 = vpop.f32.mrb[1].mxu1 }
 0x249   : > { %v1241_v23 = vadd.f32 %v1240_v22, %v1239_v20  ;;  %v1242_v24 = vpop.f32.mrb[2].mxu1 }
 0x24a   : > { %v1243_v25 = vpop.f32.mrb[3].mxu1 }
 0x24b   : > { %v1244_v26 = vadd.f32 %v1243_v25, %v1242_v24 }
 0x24d   : > { %v743_v28 = vpack.c.bf16 %v1244_v26, %v1241_v23 }
 0x24f   : > { %v753_v29 = vadd.bf16 %v752_v27, %v743_v28  ;;  %v1245_v30 = vpop.f32.mrb[4].mxu1 }
 0x250   : > { %v1246_v31 = vpop.f32.mrb[5].mxu1 }
 0x251   : > { %v1247_v32 = vadd.f32 %v1246_v31, %v1245_v30  ;;  %v1248_v33 = vpop.f32.mrb[6].mxu1  ;;  %v755_v34 = vmul.bf16 1009007652, %v753_v29 }
 0x252   : > { %v1249_v35 = vpop.f32.mrb[7].mxu1 }
 0x253   : > { %v1250_v36 = vadd.f32 %v1249_v35, %v1248_v33  ;;  %v757_v37 = vmax.bf16 %v755_v34, %v753_v29 }
 0x255   : > { %v744_v38 = vpack.c.bf16 %v1250_v36, %v1247_v32  ;;  %1287 = vmatprep.mubr.bf16.mxu0 %v757_v37 }
 0x257   : > { %v754_v39 = vadd.bf16 %v752_v27, %v744_v38 }
 0x259   : > { %v756_v40 = vmul.bf16 1009007652, %v754_v39 }
 0x25b   : > { %v758_v41 = vmax.bf16 %v756_v40, %v754_v39 }
 0x25d   : > { %1288 = vmatmul.mubr.bf16.vlgmr.msra.gmra.mrb[8].mxu0 %v758_v41 }
 0x330   : > { %v1289_v48 = vpop.f32.mrb[8].mxu0 }
 0x331   : > { %v857_v49 = vpop.f32.mrb[9].mxu0 }
 0x332   : > { %v1290_v51 = vpop.f32.mrb[10].mxu0 }
 0x333   : > { %v873_v52 = vpack.c.bf16 %v1290_v51, %v1289_v48  ;;  %v860_v53 = vpop.f32.mrb[11].mxu0 }
 0x334   : > { %v872_v54 = vpack.c.bf16 %v860_v53, %v857_v49 }
 0x335   : > { %v883_v55 = vadd.bf16 %v881_v50, %v873_v52 }
 0x336   : > { %v882_v56 = vadd.bf16 %v881_v50, %v872_v54 }
 0x337   : > { %v885_v57 = vmul.bf16 1009007652, %v883_v55 }
 0x338   : > { %v884_v58 = vmul.bf16 1009007652, %v882_v56 }
 0x339   : > { %v887_v60 = vmax.bf16 %v885_v57, %v883_v55 }
 0x33a   : > { %v886_v59 = vmax.bf16 %v884_v58, %v882_v56 }
 0x33c   : > { %1307 = vmatprep.mubr.bf16.mxu1 %v886_v59 }
 0x33d   : > { %1308 = vmatmul.mubr.bf16.vlgmr.msra.gmra.mrb[8].mxu1 %v887_v60 }
 0x410   : > { %v1309_v63 = vpop.f32.mrb[8].mxu1 }
 0x411   : > { %v986_v0 = vpop.f32.mrb[9].mxu1 }
 0x412   : > { %v1310_v2 = vpop.f32.mrb[10].mxu1 }
 0x413   : > { %v1002_v3 = vpack.c.bf16 %v1310_v2, %v1309_v63  ;;  %v989_v4 = vpop.f32.mrb[11].mxu1 }
 0x414   : > { %v1001_v5 = vpack.c.bf16 %v989_v4, %v986_v0 }
 0x415   : > { %v1012_v6 = vadd.bf16 %v1010_v1, %v1002_v3 }
 0x416   : > { %v1011_v7 = vadd.bf16 %v1010_v1, %v1001_v5 }
 0x417   : > { %v1014_v8 = vmul.bf16 1009007652, %v1012_v6 }
 0x418   : > { %v1013_v9 = vmul.bf16 1009007652, %v1011_v7  ;;  %1043 = sbr.rel (!%p2022_p9) target bundleno = 1084 (0x43c), region = 72 }
 0x419   : > { %v1016_v10 = vmax.bf16 %v1014_v8, %v1012_v6 }
 0x41a   : > { %v1015_v11 = vmax.bf16 %v1013_v9, %v1011_v7 }
 0x41b   : > { %v1210_v12 = vcombine.low %v1016_v10, %v1016_v10  ;;  %v1211_v13 = vcombine.high %v1016_v10, %v1016_v10 }
 0x41c   : > { %v1208_v14 = vcombine.low %v1015_v11, %v1015_v11  ;;  %v1209_v15 = vcombine.high %v1015_v11, %v1015_v11 }
 0x41d   : > { %1034 = vst.msk [vmem:[%s385_s19 + $0x8] sm:$0xf] %vm1031_vm1, %v1210_v12  ;;  %1035 = vst.msk [vmem:[%s385_s19 + $0xc] sm:$0xf] %vm1031_vm1, %v1211_v13 }
 0x41e   : > { %1032 = vst.msk [vmem:[%s385_s19] sm:$0xf] %vm1031_vm1, %v1208_v14  ;;  %1033 = vst.msk [vmem:[%s385_s19 + $0x4] sm:$0xf] %vm1031_vm1, %v1209_v15 }
 0x41f   : > { %s2035_s22 = smov (!%p1046_p10, %s1045_s22), 4 }
 0x420   : > { %s1930_s29 = sshll.u32 %s2035_s22, 6 }
 0x421   : > { %s1050_s15 = ssub.s32 256, %s1930_s29 }
 0x422   : > { %1051 = vsyncadd %s1037_s27, %s1050_s15  ;;  %p1215_p1 = scmp.ne.s32.totalorder %s1930_s29, 0  ;;  %s1222_s20 = sshll.u32 %s1666_s13, 8 }
 0x423   : > { %s2023_s26 = sld [smem:[#allocation16_spill]]  ;;  %s1056_s9 = sshll.u32 %s385_s19, 4  ;;  %s1942_s9 = int_to_ptr.vmem [resolvable:$true] %s1056_s9 }
 0x424   : > { %s1509_s30 = scalar_lea.vmem %s1942_s9, %s1930_s29  ;;  %s1592_s16 = smov [#allocation8]  }
 0x425   : > { %p1510_p3 = scmp.ne.s32.totalorder %s1942_s9, %s1509_s30  ;;  %s1513_s14 = sshll.u32 %s1592_s16, 4  ;;  %s1514_s14 = int_to_ptr.vmem [resolvable:$false] %s1513_s14 }
 0x426   : > { %s1515_s13 = scalar_lea.vmem %s1514_s14, 512  ;;  %p1516_p11 = scmp.lt.s32.totalorder %s1942_s9, %s1514_s14 }
 0x427   : > { %p1511_p5 = pnand %p1510_p3, %p1215_p1  ;;  %p1517_p13 = scmp.lt.s32.totalorder %s1515_s13, %s1509_s30 }
 0x429   : > { %s1940_s17 = scalar_lea.hbm %s2023_s26, %s1222_s20  ;;  %p1512_p6 = pneg %p1511_p5 }
 0x42a   : > { %p1518_p0 = por %p1517_p13, %p1516_p11 }
 0x42c   : > { %p1519_p12 = pnand %p1518_p0, %p1512_p6 }
 0x42e   : > { %1522 = shalt.err (!%p1519_p12)
}
 0x42f   : > { %s1523_s28 = scalar_lea.hbm %s1940_s17, %s1930_s29  ;;  %s1527_s25 = scalar_lea.hbm %s2023_s26, 448 }
 0x430   : > { %p1524_p7 = scmp.ne.s32.totalorder %s1940_s17, %s1523_s28  ;;  %p1528_p9 = scmp.lt.u32.totalorder %s1940_s17, %s2023_s26 }
 0x431   : > { %p1529_p10 = scmp.lt.u32.totalorder %s1527_s25, %s1523_s28  ;;  %p1531_p5 = scmp.lt.u32.totalorder %s1523_s28, %s1940_s17 }
 0x432   : > { %p1525_p2 = pnand %p1524_p7, %p1215_p1 }
 0x433   : > { %p1530_p3 = por %p1529_p10, %p1528_p9 }
 0x434   : > { %p1526_p8 = pneg %p1525_p2 }
 0x435   : > { %p1532_p6 = por %p1531_p5, %p1530_p3 }
 0x437   : > { %p1533_p11 = pnand %p1532_p6, %p1526_p8 }
 0x439   : > { %1536 = shalt.err (!%p1533_p11)
}
 0x43a   : > { %s1593_s20 = smov 64   ;;  %s1594_s21 = smov 4  }
 0x43b   : > { %1062 = dma.vmem_to_hbm [thread:$0]  (%p1215_p1), %s1942_s9, %s1930_s29, %s1940_s17, %s1037_s27, %s1593_s20, %s1593_s20, %s1594_s21  }
 0x43c PF: > { %s2024_s23 = sld [smem:[#allocation12_spill]]  ;;  %s2025_s30 = sld [smem:[#allocation15_spill]] }
 0x442   : > { %s1071_s16 = sand.u32 1, %s2024_s23   ;;  %p2026_p13 = scmp.ne.s32.totalorder %s2025_s30, 0 }
 0x443   : > { %s1072_s14 = scalar_lea.sflag [#allocation4], %s1071_s16 }
 0x444   : > { %p1329_p0 = pnand %p1152_p4, %p2026_p13 }
 0x446   : > { %1562 = dma.done.wait (!%p1329_p0), %s1072_s14, 256  }
 0x447   : > { %1564 = vsyncadd (!%p1329_p0), %s1072_s14, 4294967040  ;;  %s2027_s12 = sld [smem:[#allocation13_spill]]  ;;  %s2028_s13 = sld [smem:[#allocation14_spill]] }
 0x448   : > { %s2029_s30 = smov %s1571_s10  ;;  %s2030_s10 = smov %s1575_s11 }
 0x44d   : > { %p23_p12 = scmp.ge.s32.totalorder %s2027_s12, 4   ;;  %s2031_s11 = smov %s2028_s13 }
 0x44f   :  { %25 = sbr.rel (!%p23_p12) target bundleno = 8 (0x8), region = 109 }
 0x456   :  { %1077 = vsyncpa [#allocation3], 1 }
 0x457   :  { %1079 = vsyncpa [#allocation3 + $0x1], 1 }
 0x458   :  { %1080 = vsyncpa [#allocation6], 1 }
 0x459   :  { %1081 = vsyncpa [#allocation4], 1 }
 0x45a   :  { %1083 = vsyncpa [#allocation4 + $0x1], 1 }

</bundles_post_ra>
